<compile_context>
chip_gen: v6e
topology: v6e:2x2x1
jax: 0.10.0
libtpu: 0.0.40
codegen_flags: <defaults>
</compile_context>

<pallas_src>
import numpy as np
import jax
import jax.numpy as jnp
from jax.experimental import pallas as pl
from jax.experimental.pallas import tpu as pltpu

_VMEM_LIMIT = 40 * 1024 * 1024  # safe on v5e/v6e (128 MiB) and v7x (64 MiB physical)


def _round_up(x, m):
    return (x + m - 1) // m * m


# ----------------------------- STFT magnitude -----------------------------

def make_stft_consts(fft_size, win_length):
    """Window-folded one-sided DFT matrix, lane-padded: [n_fft, 2*F_pad] = (cos | -sin)."""
    n_freq = fft_size // 2 + 1
    f_pad = _round_up(n_freq, 128)
    # periodic hann window, zero-padded & centered to n_fft (torch.stft behaviour)
    n = np.arange(win_length, dtype=np.float64)
    win = 0.5 - 0.5 * np.cos(2.0 * np.pi * n / win_length)
    win_full = np.zeros((fft_size,), np.float64)
    left = (fft_size - win_length) // 2
    win_full[left:left + win_length] = win
    nn_ = np.arange(fft_size, dtype=np.float64)[:, None]
    kk = np.arange(n_freq, dtype=np.float64)[None, :]
    ang = 2.0 * np.pi * nn_ * kk / fft_size
    dft = np.zeros((fft_size, 2 * f_pad), np.float32)
    dft[:, :n_freq] = (win_full[:, None] * np.cos(ang)).astype(np.float32)
    dft[:, f_pad:f_pad + n_freq] = (win_full[:, None] * (-np.sin(ang))).astype(np.float32)
    return jnp.asarray(dft), f_pad, n_freq


def _make_stft_kernel(f_pad):
    def kernel(frames_ref, dft_ref, out_ref):
        # frames_ref: [TILE_R, n_fft]; dft_ref: [n_fft, 2*F_pad]; out_ref: [TILE_R, F_pad]
        z = jnp.dot(frames_ref[...], dft_ref[...], preferred_element_type=jnp.float32)
        re = z[:, :f_pad]
        im = z[:, f_pad:]
        out_ref[...] = jnp.sqrt(jnp.maximum(re * re + im * im, 1e-7))
    return kernel


def stft_magnitude(wav, fft_size, hop, dft, f_pad):
    """wav: [B, T] -> magnitude [B, n_frames, F_pad] (padded bins handled by zero weights)."""
    B, T = wav.shape
    pad = fft_size // 2
    xpad = jnp.pad(wav, ((0, 0), (pad, pad)), mode="reflect")
    n_frames = 1 + T // hop
    idx = jnp.arange(n_frames)[:, None] * hop + jnp.arange(fft_size)[None, :]
    frames = jnp.take(xpad, idx, axis=1).reshape(B * n_frames, fft_size).astype(jnp.float32)

    R = B * n_frames
    # largest frame tile such that resident DFT + double-buffered in/out tiles fit the budget
    budget = 32 * 1024 * 1024
    resident = int(dft.size) * 4
    tile_r = 512
    while tile_r > 8 and resident + 2 * tile_r * (fft_size + f_pad) * 4 > budget:
        tile_r //= 2
    tile_r = min(tile_r, _round_up(R, 8))
    r_pad = _round_up(R, tile_r)
    if r_pad != R:
        frames = jnp.pad(frames, ((0, r_pad - R), (0, 0)))

    mag = pl.pallas_call(
        _make_stft_kernel(f_pad),
        out_shape=jax.ShapeDtypeStruct((r_pad, f_pad), jnp.float32),
        grid=(r_pad // tile_r,),
        in_specs=[
            pl.BlockSpec((tile_r, fft_size), lambda i: (i, 0)),
            pl.BlockSpec(dft.shape, lambda i: (0, 0)),   # resident across the grid
        ],
        out_specs=pl.BlockSpec((tile_r, f_pad), lambda i: (i, 0)),
        compiler_params=pltpu.CompilerParams(
            dimension_semantics=("parallel",), vmem_limit_bytes=_VMEM_LIMIT),
    )(frames, dft)
    return mag[:R].reshape(B, n_frames, f_pad)


# ----------------------- per-column 1-D conv along H (W kernel = 1) -----------------------

def _make_conv_kernel(Km, H_out, apply_act, slope):
    def kernel(x_ref, w_ref, b_ref, o_ref):
        # x_ref: [1, H2, C2]; w_ref: [Km, C2, C_out]; b_ref: [1, C_out]; o_ref: [1, H_out, C_out]
        x = x_ref[0]                                     # [H2, C2]
        c_out = w_ref.shape[2]
        acc = jnp.zeros((H_out, c_out), jnp.float32)
        for m in range(Km):                              # K small & static
            acc = acc + jnp.dot(x[m:m + H_out, :], w_ref[m],
                                preferred_element_type=jnp.float32)
        acc = acc + b_ref[...]
        if apply_act:
            acc = jnp.where(acc >= 0.0, acc, slope * acc)   # LeakyReLU(slope)
        o_ref[0] = acc
    return kernel


def _fold_stride2(x, w):
    """Rewrite a stride-2 valid conv along H as a stride-1 conv on even/odd-folded channels.

    x: [N, H_pad, C_in] -> [N, ceil(H_pad/2), 2*C_in]
    w: [K, C_in, C_out] -> [ceil(K/2), 2*C_in, C_out]   (odd K gets a zero tap appended)
    y[h] = sum_k x[2h+k] @ W[k] == sum_m x2[h+m] @ W2[m]   (bit-exact)
    """
    N, H_pad, C_in = x.shape
    K, _, C_out = w.shape
    if H_pad % 2:
        x = jnp.pad(x, ((0, 0), (0, 1), (0, 0)))
    x2 = x.reshape(N, (H_pad + 1) // 2, 2 * C_in)
    if K % 2:
        w = jnp.concatenate([w, jnp.zeros((1, C_in, C_out), w.dtype)], axis=0)
    w2 = w.reshape((K + 1) // 2, 2 * C_in, C_out)
    return x2, w2


def _conv_columns(x, w, b, stride, apply_act, slope):
    """x: [N, H_pad, C_in] (already H-padded). Valid conv along H with stride in {1, 2}."""
    N, H_pad, C_in = x.shape
    K, _, C_out = w.shape
    H_out = (H_pad - K) // stride + 1
    if stride == 2:
        x, w = _fold_stride2(x, w)
    elif stride != 1:
        raise ValueError("only strides 1 and 2 are supported")
    Km, C2 = int(w.shape[0]), int(w.shape[1])
    H2 = int(x.shape[1])
    b2 = b.reshape(1, C_out).astype(jnp.float32)

    y = pl.pallas_call(
        _make_conv_kernel(Km, H_out, apply_act, slope),
        out_shape=jax.ShapeDtypeStruct((N, H_out, C_out), jnp.float32),
        grid=(N,),
        in_specs=[
            pl.BlockSpec((1, H2, C2), lambda i: (i, 0, 0)),
            pl.BlockSpec((Km, C2, C_out), lambda i: (0, 0, 0)),   # resident
            pl.BlockSpec((1, C_out), lambda i: (0, 0)),            # resident
        ],
        out_specs=pl.BlockSpec((1, H_out, C_out), lambda i: (i, 0, 0)),
        compiler_params=pltpu.CompilerParams(
            dimension_semantics=("parallel",), vmem_limit_bytes=_VMEM_LIMIT),
    )(x, w, b2)
    return y


def conv_block_dedup(data, gens, w, b, stride, pad_h, pad_w, apply_act, slope=0.1):
    """One Conv2d((K,1), (stride,1), padding=(pad_h,pad_w)) [+ LeakyReLU] on the
    deduplicated column representation.

    data: [B, H, C_in]  -- the unique per-batch data column
    gens: [G, H, C_in]  -- batch-independent columns created by earlier W padding
    Returns (data_out [B,H',C_out], gens_out [G(+1),H',C_out]); a new generation is
    appended iff pad_w > 0 (the conv output of an all-zero column).
    """
    B, H, C_in = data.shape
    cols = [data, gens]
    if pad_w > 0:
        cols.append(jnp.zeros((1, H, C_in), jnp.float32))
    x = jnp.concatenate(cols, axis=0)
    if pad_h > 0:
        x = jnp.pad(x, ((0, 0), (pad_h, pad_h), (0, 0)))
    y = _conv_columns(x, w, b, stride, apply_act, slope)
    return y[:B], y[B:]


def _columns_to_nchw(data, gens, gen_pads):
    """Rebuild the full NCHW feature map [B, C, H, W] from deduplicated columns.
    W layout (bit-exact): newest generation outermost,
    [gen_L x p_L, ..., gen_1 x p_1, data, gen_1 x p_1, ..., gen_L x p_L]."""
    B, H, C = data.shape
    left = []
    for j in range(len(gen_pads) - 1, -1, -1):
        left.append(jnp.broadcast_to(gens[j][None, None], (B, gen_pads[j], H, C)))
    pieces = left + [data[:, None]] + left[::-1]
    full = jnp.concatenate(pieces, axis=1)          # [B, W, H, C]
    return jnp.transpose(full, (0, 3, 2, 1))        # [B, C, H, W]


# ----------------------------- parameters -----------------------------

def init_spec_disc_params(key, *, channels, fft_size, shift_size, win_length,
                          init_kernel=15, kernel_size=11, stride=2,
                          final_kernel=5, post_kernel=3, blocks=3):
    dft, f_pad, n_freq = make_stft_consts(fft_size, win_length)
    specs = [(n_freq, channels, init_kernel, 1)]
    specs += [(channels, channels, kernel_size, stride)] * blocks
    specs += [(channels, channels, final_kernel, 1)]
    convs = []
    keys = jax.random.split(key, len(specs) + 1)
    for li, (k_, (cin, cout, ksz, st)) in enumerate(zip(keys[:-1], specs)):
        kw, kb = jax.random.split(k_)
        # weight layout [K, C_in, C_out] (transpose of torch [C_out, C_in, K, 1]);
        # weight_norm is identity at init -> plain conv weights.
        w = 0.05 * jax.random.normal(kw, (ksz, cin, cout), jnp.float32)
        if li == 0 and f_pad != n_freq:
            # zero-pad C_in to the lane-padded STFT width (exact: padded bins * 0 = 0)
            w = jnp.pad(w, ((0, 0), (0, f_pad - n_freq), (0, 0)))
        b = 0.05 * jax.random.normal(kb, (cout,), jnp.float32)
        convs.append((w, b, st, (ksz - 1) // 2))
    kw, kb = jax.random.split(keys[-1])
    wp = 0.05 * jax.random.normal(kw, (post_kernel, channels, 1), jnp.float32)
    bp = 0.05 * jax.random.normal(kb, (1,), jnp.float32)
    return {"convs": convs, "conv_post": (wp, bp), "dft": dft, "f_pad": f_pad,
            "fft_size": fft_size, "shift_size": shift_size, "win_length": win_length}


def init_multi_spec_params(key, fft_sizes, hop_sizes, win_lengths, channels=8, **kw):
    keys = jax.random.split(key, len(fft_sizes))
    return [init_spec_disc_params(k, channels=channels, fft_size=f, shift_size=h,
                                  win_length=wl, **kw)
            for k, f, h, wl in zip(keys, fft_sizes, hop_sizes, win_lengths)]


# ----------------------------- forward passes -----------------------------

def spec_discriminator_forward(wav, params, slope=0.1):
    """wav: [B, 1, T] -> (x, fmap); fmap entries are NCHW like the PyTorch module."""
    wav2 = jnp.squeeze(wav, 1).astype(jnp.float32)
    mag = stft_magnitude(wav2, params["fft_size"], params["shift_size"],
                         params["dft"], params["f_pad"])           # [B, frames, F_pad]
    # torch: x = transpose(x_mag, 2, 1).unsqueeze(-1) -> NCHW [B, freq, frames, 1].
    # Channels-last column state: data column == mag, W == 1, no pad generations yet.
    data = mag
    gens = jnp.zeros((0,) + mag.shape[1:], jnp.float32)
    gen_pads = []
    fmap = []
    for (w, b, st, pad) in params["convs"]:
        # NOTE: the PyTorch module passes an int padding => both H and W are padded.
        data, gens = conv_block_dedup(data, gens, w, b, stride=st,
                                      pad_h=pad, pad_w=pad, apply_act=True, slope=slope)
        if pad > 0:
            gen_pads = gen_pads + [pad]
        fmap.append(_columns_to_nchw(data, gens, gen_pads))
    wp, bp = params["conv_post"]
    data, gens = conv_block_dedup(data, gens, wp, bp, stride=1,
                                  pad_h=1, pad_w=0, apply_act=False, slope=slope)
    x = _columns_to_nchw(data, gens, gen_pads)
    fmap.append(x)
    if x.shape[-1] == 1:                     # torch .squeeze(-1) semantics
        x = jnp.squeeze(x, -1)
    return x, fmap


def multi_spec_discriminator_forward(wav, params_list, slope=0.1):
    y_d, fmaps = [], []
    for p in params_list:
        x, fm = spec_discriminator_forward(wav, p, slope=slope)
        y_d.append(x)
        fmaps.append(fm)
    return y_d, fmaps


# ----------------------------- demo -----------------------------

if __name__ == "__main__":
    key = jax.random.PRNGKey(0)
    k_wav, k_par = jax.random.split(key)

    # Small configs consistent with MultiSpecDiscriminator's structure
    # (real defaults: fft 1024/2048/512, hop 120/240/50, win 600/1200/240, channels=32;
    #  the default dict's 'kernel_sizes' key is treated as kernel_size).
    fft_sizes, hop_sizes, win_lengths = [64, 128], [8, 16], [32, 64]
    channels, B, T = 8, 2, 256

    wav = jax.random.normal(k_wav, (B, 1, T), jnp.float32)
    params = init_multi_spec_params(k_par, fft_sizes, hop_sizes, win_lengths,
                                    channels=channels)

    y_d, fmaps = multi_spec_discriminator_forward(wav, params)
    for x in y_d:
        jax.block_until_ready(x)
    for fm in fmaps:
        for f in fm:
            jax.block_until_ready(f)

    print("KERNEL_OK")
</pallas_src>

<mosaic_0001>
module attributes {stable_mosaic.version = 11 : i64} {
  func.func @kernel(%arg0: i32, %arg1: memref<72x64xf32, #tpu.memory_space<vmem>>, %arg2: memref<64x256xf32, #tpu.memory_space<vmem>>, %arg3: memref<72x128xf32, #tpu.memory_space<vmem>>) attributes {dimension_semantics = [#tpu.dimension_semantics<parallel>], iteration_bounds = array<i64: 1>, scalar_prefetch = 0 : i64, scratch_operands = 0 : i64, tpu.core_type = #tpu.core_type<tc>, window_params = [{transform_indices = @transform_0, window_bounds = array<i64: 72, 64>}, {pipeline_mode = #tpu.pipeline_mode<synchronous>, transform_indices = @transform_1, window_bounds = array<i64: 64, 256>}, {transform_indices = @transform_2, window_bounds = array<i64: 72, 128>}]} {
    %c0 = arith.constant 0 : index
    %c0_0 = arith.constant 0 : index
    %0 = vector.load %arg1[%c0, %c0_0] : memref<72x64xf32, #tpu.memory_space<vmem>>, vector<72x64xf32>
    %c0_1 = arith.constant 0 : index
    %c0_2 = arith.constant 0 : index
    %1 = vector.load %arg2[%c0_1, %c0_2] : memref<64x256xf32, #tpu.memory_space<vmem>>, vector<64x256xf32>
    %cst = arith.constant dense<0.000000e+00> : vector<72x256xf32>
    %2 = tpu.matmul %0, %1, %cst {dimension_numbers = #tpu.dot_dimension_numbers<[1], [0], [0], [1], [0, 0, 1, 1], [], []>} : vector<72x64xf32>, vector<64x256xf32>, vector<72x256xf32> -> vector<72x256xf32>
    %3 = vector.extract_strided_slice %2 {offsets = [0, 0], sizes = [72, 128], strides = [1, 1]} : vector<72x256xf32> to vector<72x128xf32>
    %4 = vector.extract_strided_slice %2 {offsets = [0, 128], sizes = [72, 128], strides = [1, 1]} : vector<72x256xf32> to vector<72x128xf32>
    %5 = arith.mulf %3, %3 : vector<72x128xf32>
    %6 = arith.mulf %4, %4 : vector<72x128xf32>
    %7 = arith.addf %5, %6 : vector<72x128xf32>
    %cst_3 = arith.constant 1.000000e-07 : f32
    %8 = vector.broadcast %cst_3 : f32 to vector<72x128xf32>
    %9 = arith.maximumf %7, %8 : vector<72x128xf32>
    %10 = math.sqrt %9 : vector<72x128xf32>
    %c0_4 = arith.constant 0 : index
    %c0_5 = arith.constant 0 : index
    %11 = vector.load %arg3[%c0_4, %c0_5] : memref<72x128xf32, #tpu.memory_space<vmem>>, vector<72x128xf32>
    tpu.vector_store %arg3[%c0_4, %c0_5], %10 {strides = array<i32>} : memref<72x128xf32, #tpu.memory_space<vmem>>, vector<72x128xf32>,
    return
  }
  func.func @transform_0(%arg0: i32) -> (i32, i32) {
    %c0_i32 = arith.constant 0 : i32
    %c0_i32_0 = arith.constant 0 : i32
    return %arg0, %c0_i32 : i32, i32
  }
  func.func @transform_1(%arg0: i32) -> (i32, i32) {
    %c0_i32 = arith.constant 0 : i32
    %c0_i32_0 = arith.constant 0 : i32
    %c0_i32_1 = arith.constant 0 : i32
    return %c0_i32, %c0_i32_0 : i32, i32
  }
  func.func @transform_2(%arg0: i32) -> (i32, i32) {
    %c0_i32 = arith.constant 0 : i32
    %c0_i32_0 = arith.constant 0 : i32
    return %arg0, %c0_i32 : i32, i32
  }
}

</mosaic_0001>

<bundles_post_ra>
// kernel: tpu_custom_call.1
= control target key start
LH: loop header
LB: loop body
LE: loop exit
PB: predicated region body
PF: predicated region fallthrough
CT: control target
= control target key end

     0   :  { %s515_s0 = inlined_call_operand.vmem [shape: f32[72,64], index: 0, kind: input, shape index: {}]   ;;  %s516_s1 = inlined_call_operand.vmem [shape: f32[64,256], index: 1, kind: input, shape index: {}]   ;;  %s517_s2 = inlined_call_operand.hbm [shape: f32[72,128], index: 2, kind: output, shape index: {}]  }
   0x1   :  { %v36_v0 = vld [vmem:[%s516_s1 + $0x78] sm:$0xff]  ;;  %v35_v1 = vld [vmem:[%s516_s1 + $0x70] sm:$0xff]  ;;  %v34_v2 = vld [vmem:[%s516_s1 + $0x68] sm:$0xff] }
   0x2   :  { %81 = vmatprep.subr.mxu0 %v36_v0  ;;  %317 = vmatprep.subr.mxu1 %v36_v0  ;;  %v33_v3 = vld [vmem:[%s516_s1 + $0x60] sm:$0xff]  ;;  %v32_v4 = vld [vmem:[%s516_s1 + $0x58] sm:$0xff]  ;;  %v31_v5 = vld [vmem:[%s516_s1 + $0x50] sm:$0xff] }
   0x3   :  { %82 = vmatpush1.msra.mxu0 %v35_v1  ;;  %325 = vmatpush1.msra.mxu1 %v35_v1  ;;  %v30_v6 = vld [vmem:[%s516_s1 + $0x48] sm:$0xff]  ;;  %v29_v7 = vld [vmem:[%s516_s1 + $0x40] sm:$0xff]  ;;  %v28_v8 = vld [vmem:[%s516_s1 + $0x38] sm:$0xff] }
   0x4   :  { %83 = vmatprep.subr.mxu0 %v34_v2  ;;  %318 = vmatprep.subr.mxu1 %v34_v2  ;;  %v27_v9 = vld [vmem:[%s516_s1 + $0x30] sm:$0xff]  ;;  %v26_v10 = vld [vmem:[%s516_s1 + $0x28] sm:$0xff] }
   0x5   :  { %84 = vmatpush1.msra.mxu0 %v33_v3  ;;  %326 = vmatpush1.msra.mxu1 %v33_v3 }
   0x6   :  { %85 = vmatprep.subr.mxu0 %v32_v4  ;;  %319 = vmatprep.subr.mxu1 %v32_v4 }
   0x7   :  { %86 = vmatpush1.msra.mxu0 %v31_v5  ;;  %327 = vmatpush1.msra.mxu1 %v31_v5 }
   0x8   :  { %87 = vmatprep.subr.mxu0 %v30_v6  ;;  %320 = vmatprep.subr.mxu1 %v30_v6 }
   0x9   :  { %88 = vmatpush1.msra.mxu0 %v29_v7  ;;  %328 = vmatpush1.msra.mxu1 %v29_v7 }
   0xa   :  { %7 = vsyncpa [#allocation3], 0  ;;  %89 = vmatprep.subr.mxu0 %v28_v8  ;;  %321 = vmatprep.subr.mxu1 %v28_v8  ;;  %v25_v11 = vld [vmem:[%s516_s1 + $0x20] sm:$0xff]  ;;  %v24_v12 = vld [vmem:[%s516_s1 + $0x18] sm:$0xff]  ;;  %vm37_vm0 = vcmask 523264   ;;  %v377_v18 = vmov 0.0  }
   0xb   :  { %90 = vmatpush1.msra.mxu0 %v27_v9  ;;  %329 = vmatpush1.msra.mxu1 %v27_v9  ;;  %v23_v13 = vld [vmem:[%s516_s1 + $0x10] sm:$0xff]  ;;  %v22_v14 = vld [vmem:[%s516_s1 + $0x8] sm:$0xff]  ;;  %v21_v15 = vld [vmem:[%s516_s1] sm:$0xff] }
   0xc   :  { %91 = vmatprep.subr.mxu0 %v26_v10  ;;  %322 = vmatprep.subr.mxu1 %v26_v10  ;;  %v12_v16 = vld [vmem:[%s515_s0] sm:$0xff]  ;;  %v17_v17 = vld [vmem:[%s515_s0 + $0x28] sm:$0xff]  ;;  %v18_v20 = vld [vmem:[%s515_s0 + $0x30] sm:$0xff] }
   0xd   :  { %92 = vmatpush1.msra.mxu0 %v25_v11  ;;  %330 = vmatpush1.msra.mxu1 %v25_v11  ;;  %v13_v19 = vld [vmem:[%s515_s0 + $0x8] sm:$0xff]  ;;  %v14_v21 = vld [vmem:[%s515_s0 + $0x10] sm:$0xff]  ;;  %v19_v22 = vld [vmem:[%s515_s0 + $0x38] sm:$0xff] }
   0xe   :  { %93 = vmatprep.subr.mxu0 %v24_v12  ;;  %323 = vmatprep.subr.mxu1 %v24_v12  ;;  %v15_v23 = vld [vmem:[%s515_s0 + $0x18] sm:$0xff]  ;;  %v20_v24 = vld [vmem:[%s515_s0 + $0x40] sm:$0xff] }
   0xf   :  { %94 = vmatpush1.msra.mxu0 %v23_v13  ;;  %331 = vmatpush1.msra.mxu1 %v23_v13  ;;  %v16_v25 = vld [vmem:[%s515_s0 + $0x20] sm:$0xff]  ;;  %s378_s0 = smov [#allocation2]  }
  0x10   :  { %95 = vmatprep.subr.mxu0 %v22_v14  ;;  %324 = vmatprep.subr.mxu1 %v22_v14  ;;  %s297_s30 = sshll.u32 %s378_s0, 4  ;;  %s298_s30 = int_to_ptr.vmem [resolvable:$true] %s297_s30 }
  0x11   :  { %96 = vmatpush1.msra.mxu0 %v21_v15  ;;  %332 = vmatpush1.msra.mxu1 %v21_v15  ;;  %s355_s3 = scalar_lea.vmem %s298_s30, 1152  ;;  %p360_p1 = scmp.lt.s32.totalorder %s298_s30, %s298_s30 }
  0x12   :  { %129 = vmatprep.mubr.f32.mxu0 %v377_v18  ;;  %159 = vmatprep.mubr.f32.mxu1 %v377_v18  ;;  %p356_p0 = scmp.ne.s32.totalorder %s298_s30, %s355_s3  ;;  %p361_p2 = scmp.lt.s32.totalorder %s355_s3, %s355_s3 }
  0x13   :  { %308 = vmatmul.mubr.msk.f32.vlgmr.msra.gmra.mxu0 %vm37_vm0, %v12_v16  ;;  %313 = vmatmul.mubr.msk.f32.vlgmr.msra.gmra.mxu1 %vm37_vm0, %v17_v17 }
  0x14   :  { %135 = vmatprep.mubr.f32.mxu0 %v377_v18  ;;  %165 = vmatprep.mubr.f32.mxu1 %v377_v18  ;;  %p362_p3 = por %p361_p2, %p360_p1 }
  0x16   :  { %p363_p4 = pnand %p362_p3, %p356_p0 }
  0x17   :  { %309 = vmatmul.mubr.msk.f32.gmra.mxu0 %vm37_vm0, %v13_v19  ;;  %314 = vmatmul.mubr.msk.f32.gmra.mxu1 %vm37_vm0, %v18_v20 }
  0x18   :  { %141 = vmatprep.mubr.f32.mxu0 %v377_v18  ;;  %171 = vmatprep.mubr.f32.mxu1 %v377_v18 }
  0x1b   :  { %310 = vmatmul.mubr.msk.f32.gmra.mxu0 %vm37_vm0, %v14_v21  ;;  %315 = vmatmul.mubr.msk.f32.gmra.mxu1 %vm37_vm0, %v19_v22 }
  0x1c   :  { %147 = vmatprep.mubr.f32.mxu0 %v377_v18  ;;  %177 = vmatprep.mubr.f32.mxu1 %v377_v18 }
  0x1f   :  { %311 = vmatmul.mubr.msk.f32.gmra.mxu0 %vm37_vm0, %v15_v23  ;;  %316 = vmatmul.mubr.msk.f32.gmra.mxu1 %vm37_vm0, %v20_v24 }
  0x20   :  { %153 = vmatprep.mubr.f32.mxu0 %v377_v18 }
  0x23   :  { %312 = vmatmul.mubr.msk.f32.gmra.mxu0 %vm37_vm0, %v16_v25 }
  0xd3   :  { %v131_v26 = vpop.f32.mrf.mxu0  ;;  %v161_v27 = vpop.f32.mrf.mxu1 }
  0xd4   :  { %v189_v28 = vmul.f32 %v161_v27, %v161_v27  ;;  %v184_v31 = vmul.f32 %v131_v26, %v131_v26 }
  0xd5   :  { %v133_v29 = vpop.f32.mrf.mxu0  ;;  %v163_v30 = vpop.f32.mrf.mxu1 }
  0xd6   :  { %v193_v32 = vmul.f32 %v133_v29, %v133_v29  ;;  %v198_v33 = vmul.f32 %v163_v30, %v163_v30 }
  0xd7   :  { %v137_v34 = vpop.f32.mrf.mxu0  ;;  %v167_v35 = vpop.f32.mrf.mxu1 }
  0xd8   :  { %v202_v36 = vadd.f32 %v193_v32, %v184_v31  ;;  %v207_v37 = vadd.f32 %v198_v33, %v189_v28  ;;  %v190_v38 = vmul.f32 %v167_v35, %v167_v35  ;;  %v185_v47 = vmul.f32 %v137_v34, %v137_v34 }
  0xd9   :  { %v139_v39 = vpop.f32.mrf.mxu0  ;;  %v169_v40 = vpop.f32.mrf.mxu1 }
  0xda   :  { %v211_v41 = vmax.f32 %v202_v36, 1e-07  ;;  %v216_v42 = vmax.f32 %v207_v37, 1e-07  ;;  %v194_v43 = vmul.f32 %v139_v39, %v139_v39  ;;  %v199_v44 = vmul.f32 %v169_v40, %v169_v40 }
  0xdb   :  { %v143_v45 = vpop.f32.mrf.mxu0  ;;  %v173_v46 = vpop.f32.mrf.mxu1 }
  0xdc   :  { %337 = vrsqrt.f32 %v211_v41  ;;  %v203_v50 = vadd.f32 %v194_v43, %v185_v47  ;;  %v208_v51 = vadd.f32 %v199_v44, %v190_v38  ;;  %v191_v52 = vmul.f32 %v173_v46, %v173_v46 }
  0xdd   :  { %339 = vrsqrt.f32 %v216_v42  ;;  %v145_v48 = vpop.f32.mrf.mxu0  ;;  %v175_v49 = vpop.f32.mrf.mxu1  ;;  %v186_v53 = vmul.f32 %v143_v45, %v143_v45  ;;  %vm222_vm1 = vcmp.eq.f32.partialorder %v211_v41, inf  ;;  %vm224_vm2 = vcmp.eq.f32.partialorder %v211_v41, 0.0 }
  0xde   :  { %v195_v54 = vmul.f32 %v145_v48, %v145_v48  ;;  %v200_v55 = vmul.f32 %v175_v49, %v175_v49  ;;  %v212_v58 = vmax.f32 %v203_v50, 1e-07  ;;  %v217_v59 = vmax.f32 %v208_v51, 1e-07 }
  0xdf   :  { %v149_v56 = vpop.f32.mrf.mxu0  ;;  %v179_v57 = vpop.f32.mrf.mxu1  ;;  %v225_v17 = vand.u32 2147483648, %v211_v41  ;;  %vm257_vm3 = vcmp.eq.f32.partialorder %v216_v42, inf  ;;  %v260_v21 = vand.u32 2147483648, %v216_v42  ;;  %vm259_vm4 = vcmp.eq.f32.partialorder %v216_v42, 0.0 }
  0xe0   :  { %v204_v60 = vadd.f32 %v195_v54, %v186_v53  ;;  %v209_v61 = vadd.f32 %v200_v55, %v191_v52  ;;  %341 = vrsqrt.f32 %v212_v58  ;;  %v192_v0 = vmul.f32 %v179_v57, %v179_v57 }
  0xe1   :  { %v151_v62 = vpop.f32.mrf.mxu0  ;;  %v181_v63 = vpop.f32.mrf.mxu1  ;;  %343 = vrsqrt.f32 %v217_v59  ;;  %v187_v7 = vmul.f32 %v149_v56, %v149_v56  ;;  %vm229_vm5 = vcmp.eq.f32.partialorder %v212_v58, inf  ;;  %v232_v29 = vand.u32 2147483648, %v212_v58 }
  0xe2   :  { %v480_v2 = vmax.f32 %v204_v60, 1e-07  ;;  %v482_v3 = vmax.f32 %v209_v61, 1e-07  ;;  %v196_v4 = vmul.f32 %v151_v62, %v151_v62  ;;  %v201_v5 = vmul.f32 %v181_v63, %v181_v63 }
  0xe3   :  { %v155_v1 = vpop.f32.mrf.mxu0  ;;  %vm231_vm6 = vcmp.eq.f32.partialorder %v212_v58, 0.0  ;;  %vm264_vm7 = vcmp.eq.f32.partialorder %v217_v59, inf  ;;  %v267_v32 = vand.u32 2147483648, %v217_v59  ;;  %vm266_vm8 = vcmp.eq.f32.partialorder %v217_v59, 0.0 }
  0xe4   :  { %345 = vrsqrt.f32 %v480_v2  ;;  %v205_v8 = vadd.f32 %v196_v4, %v187_v7  ;;  %v210_v9 = vadd.f32 %v201_v5, %v192_v0  ;;  %v188_v12 = vmul.f32 %v155_v1, %v155_v1 }
  0xe5   :  { %v157_v6 = vpop.f32.mrf.mxu0  ;;  %347 = vrsqrt.f32 %v482_v3  ;;  %vm236_vm9 = vcmp.eq.f32.partialorder %v480_v2, inf  ;;  %v239_v39 = vand.u32 2147483648, %v480_v2  ;;  %vm238_vm10 = vcmp.eq.f32.partialorder %v480_v2, 0.0 }
  0xe6   :  { %v197_v10 = vmul.f32 %v157_v6, %v157_v6  ;;  %v486_v15 = vmax.f32 %v205_v8, 1e-07  ;;  %v488_v16 = vmax.f32 %v210_v9, 1e-07  ;;  %vm271_vm11 = vcmp.eq.f32.partialorder %v482_v3, inf }
  0xe7   :  { %vm273_vm12 = vcmp.eq.f32.partialorder %v482_v3, 0.0 }
  0xe8   :  { %v206_v19 = vadd.f32 %v197_v10, %v188_v12  ;;  %349 = vrsqrt.f32 %v486_v15  ;;  %vm243_vm13 = vcmp.eq.f32.partialorder %v486_v15, inf  ;;  %v246_v49 = vand.u32 2147483648, %v486_v15 }
  0xe9   :  { %v338_v11 = vpop.eup %337  ;;  %351 = vrsqrt.f32 %v488_v16  ;;  %vm245_vm14 = vcmp.eq.f32.partialorder %v486_v15, 0.0  ;;  %vm278_vm15 = vcmp.eq.f32.partialorder %v488_v16, inf  ;;  %v281_v52 = vand.u32 2147483648, %v488_v16 }
  0xea   :  { %v340_v13 = vpop.eup %339  ;;  %v221_v14 = vmul.f32 %v338_v11, %v211_v41  ;;  %v215_v26 = vmax.f32 %v206_v19, 1e-07  ;;  %vm280_vm0 = vcmp.eq.f32.partialorder %v488_v16, 0.0 }
  0xeb   :  { %v256_v18 = vmul.f32 %v340_v13, %v216_v42 }
  0xec   :  { %v223_v20 = vsel %vm222_vm1, %v211_v41, %v221_v14  ;;  %353 = vrsqrt.f32 %v215_v26  ;;  %vm250_vm1 = vcmp.eq.f32.partialorder %v215_v26, inf }
  0xed   :  { %v226_v22 = vsel %vm224_vm2, %v225_v17, %v223_v20  ;;  %v258_v23 = vsel %vm257_vm3, %v216_v42, %v256_v18  ;;  %v342_v25 = vpop.eup %341  ;;  %v274_v42 = vand.u32 2147483648, %v482_v3  ;;  %vm252_vm2 = vcmp.eq.f32.partialorder %v215_v26, 0.0 }
  0xee   :  { %283 = vst [vmem:[#allocation2] sm:$0xff] %v226_v22  ;;  %v261_v24 = vsel %vm259_vm4, %v260_v21, %v258_v23  ;;  %v344_v27 = vpop.eup %343  ;;  %v228_v28 = vmul.f32 %v342_v25, %v212_v58 }
  0xef   :  { %288 = vst [vmem:[#allocation2 + $0x28] sm:$0xff] %v261_v24  ;;  %v263_v30 = vmul.f32 %v344_v27, %v217_v59 }
  0xf0   :  { %v230_v31 = vsel %vm229_vm5, %v212_v58, %v228_v28  ;;  %v253_v58 = vand.u32 2147483648, %v215_v26 }
  0xf1   :  { %v346_v33 = vpop.eup %345  ;;  %v233_v34 = vsel %vm231_vm6, %v232_v29, %v230_v31  ;;  %v265_v35 = vsel %vm264_vm7, %v217_v59, %v263_v30 }
  0xf2   :  { %v348_v36 = vpop.eup %347  ;;  %284 = vst [vmem:[#allocation2 + $0x8] sm:$0xff] %v233_v34  ;;  %v268_v37 = vsel %vm266_vm8, %v267_v32, %v265_v35  ;;  %v235_v38 = vmul.f32 %v346_v33, %v480_v2 }
  0xf3   :  { %289 = vst [vmem:[#allocation2 + $0x30] sm:$0xff] %v268_v37  ;;  %v270_v40 = vmul.f32 %v348_v36, %v482_v3 }
  0xf4   :  { %v237_v41 = vsel %vm236_vm9, %v480_v2, %v235_v38 }
  0xf5   :  { %v240_v43 = vsel %vm238_vm10, %v239_v39, %v237_v41  ;;  %v272_v44 = vsel %vm271_vm11, %v482_v3, %v270_v40  ;;  %v350_v46 = vpop.eup %349 }
  0xf6   :  { %285 = vst [vmem:[#allocation2 + $0x10] sm:$0xff] %v240_v43  ;;  %v275_v45 = vsel %vm273_vm12, %v274_v42, %v272_v44  ;;  %v352_v47 = vpop.eup %351  ;;  %v242_v48 = vmul.f32 %v350_v46, %v486_v15 }
  0xf7   :  { %290 = vst [vmem:[#allocation2 + $0x38] sm:$0xff] %v275_v45  ;;  %v277_v50 = vmul.f32 %v352_v47, %v488_v16 }
  0xf8   :  { %v244_v51 = vsel %vm243_vm13, %v486_v15, %v242_v48 }
  0xf9   :  { %v247_v53 = vsel %vm245_vm14, %v246_v49, %v244_v51  ;;  %v279_v54 = vsel %vm278_vm15, %v488_v16, %v277_v50  ;;  %v354_v55 = vpop.eup %353 }
  0xfa   :  { %286 = vst [vmem:[#allocation2 + $0x18] sm:$0xff] %v247_v53  ;;  %v282_v56 = vsel %vm280_vm0, %v281_v52, %v279_v54  ;;  %v249_v57 = vmul.f32 %v354_v55, %v215_v26 }
  0xfb   :  { %291 = vst [vmem:[#allocation2 + $0x40] sm:$0xff] %v282_v56 }
  0xfc   :  { %v251_v59 = vsel %vm250_vm1, %v215_v26, %v249_v57 }
  0xfd   :  { %v254_v60 = vsel %vm252_vm2, %v253_v58, %v251_v59 }
  0xfe   :  { %287 = vst [vmem:[#allocation2 + $0x20] sm:$0xff] %v254_v60 }
  0xff   :  { %366 = shalt.err (!%p363_p4)
}
 0x100   :  { %s379_s4 = smov 128   ;;  %s380_s5 = smov 8  }
 0x101   :  { %303 = dma.vmem_to_hbm [thread:$0]  %s298_s30, 1152, %s517_s2, [#allocation3], %s379_s4, %s379_s4, %s380_s5  }
 0x102   :  { %375 = dma.done.wait [#allocation3], 1152  }
 0x103   :  { %376 = vsyncadd [#allocation3], 4294966144 }
 0x104   :  { %307 = vsyncpa [#allocation3], 1 }

</bundles_post_ra>
